<compile_context>
chip_gen: v5e
topology: v5e:2x2
jax: 0.10.0
libtpu: 0.0.40
codegen_flags: <defaults>
</compile_context>

<pallas_src>
import functools
import math

import jax
import jax.numpy as jnp
from jax.experimental import pallas as pl
from jax.experimental.pallas import tpu as pltpu

LN_EPS = 1e-12                      # BERT LayerNorm eps (kept in f32)


def _vmem_limit_bytes():
    """Per-generation scoped-VMEM limit (v7x: ~48 MiB, v5e/v6e: ~96 MiB)."""
    try:
        cap = int(pltpu.get_tpu_info().vmem_capacity_bytes)
        return min(cap * 3 // 4, 96 * 1024 * 1024)
    except Exception:
        return 48 * 1024 * 1024


VMEM_LIMIT = _vmem_limit_bytes()


def _pick_tile(dim, cap, mult):
    """Largest tile <= cap that divides dim and is a multiple of `mult`;
    falls back to the full dim for small/odd dims."""
    if dim <= cap:
        return dim
    t = (cap // mult) * mult
    while t >= mult:
        if dim % t == 0:
            return t
        t -= mult
    return dim


def _pad_rows(x, tm):
    pad = (-x.shape[0]) % tm
    if pad:
        x = jnp.pad(x, ((0, pad), (0, 0)))
    return x


# ----------------------------------------------------------------------------
# Tiled linear:  o = act(x @ w + b)      (x, w, o in bf16; f32 accumulator)
# ----------------------------------------------------------------------------
def _linear_kernel(x_ref, w_ref, b_ref, o_ref, acc_ref, *, activation):
    @pl.when(pl.program_id(2) == 0)
    def _():
        acc_ref[...] = jnp.zeros_like(acc_ref)

    acc_ref[...] += jnp.dot(x_ref[...], w_ref[...],
                            preferred_element_type=jnp.float32)

    @pl.when(pl.program_id(2) == pl.num_programs(2) - 1)
    def _():
        y = acc_ref[...] + b_ref[...]
        if activation == "gelu":
            # TODO(synk): HF BERT uses the exact erf GELU; tanh approximation
            # kept for guaranteed Mosaic lowering of the elementwise path.
            y = jax.nn.gelu(y, approximate=True)
        elif activation == "tanh":
            y = jnp.tanh(y)
        o_ref[...] = y.astype(o_ref.dtype)


def linear(x, w, b, activation=None, *, tm_cap=512, tn_cap=1024, tk_cap=1536):
    M, K = x.shape
    N = w.shape[1]
    tm = min(tm_cap, M)
    xp = _pad_rows(x, tm)
    Mp = xp.shape[0]
    tn = _pick_tile(N, tn_cap, 128)
    tk = _pick_tile(K, tk_cap, 128)
    out = pl.pallas_call(
        functools.partial(_linear_kernel, activation=activation),
        out_shape=jax.ShapeDtypeStruct((Mp, N), jnp.bfloat16),
        grid_spec=pltpu.PrefetchScalarGridSpec(
            num_scalar_prefetch=0,
            grid=(Mp // tm, N // tn, K // tk),
            in_specs=[
                pl.BlockSpec((tm, tk), lambda i, j, k: (i, k)),
                pl.BlockSpec((tk, tn), lambda i, j, k: (k, j)),
                pl.BlockSpec((1, tn), lambda i, j, k: (0, j)),
            ],
            out_specs=pl.BlockSpec((tm, tn), lambda i, j, k: (i, j)),
            scratch_shapes=[pltpu.VMEM((tm, tn), jnp.float32)],
        ),
        compiler_params=pltpu.CompilerParams(
            dimension_semantics=("parallel", "parallel", "arbitrary"),
            vmem_limit_bytes=VMEM_LIMIT,
        ),
    )(xp, w, b.reshape(1, N))
    if Mp != M:
        out = out[:M]
    return out


# ----------------------------------------------------------------------------
# Fused tiled linear + residual + LayerNorm:  o = LN(x @ w + b + r) * g + beta
# (N axis = full hidden dim on lanes, so the LN reduction stays in one tile.)
# ----------------------------------------------------------------------------
def _linear_res_ln_kernel(x_ref, w_ref, b_ref, r_ref, g_ref, bb_ref,
                          o_ref, acc_ref):
    @pl.when(pl.program_id(1) == 0)
    def _():
        acc_ref[...] = jnp.zeros_like(acc_ref)

    acc_ref[...] += jnp.dot(x_ref[...], w_ref[...],
                            preferred_element_type=jnp.float32)

    @pl.when(pl.program_id(1) == pl.num_programs(1) - 1)
    def _():
        y = acc_ref[...] + b_ref[...] + r_ref[...].astype(jnp.float32)
        mu = jnp.mean(y, axis=-1, keepdims=True)
        var = jnp.mean(jnp.square(y - mu), axis=-1, keepdims=True)
        o_ref[...] = (((y - mu) * jax.lax.rsqrt(var + LN_EPS)) * g_ref[...]
                      + bb_ref[...]).astype(o_ref.dtype)


def linear_residual_layernorm(x, w, b, residual, gamma, beta, *,
                              tm_cap=512, tk_cap=1536):
    M, K = x.shape
    N = w.shape[1]
    tm = min(tm_cap, M)
    xp = _pad_rows(x, tm)
    rp = _pad_rows(residual, tm)
    Mp = xp.shape[0]
    tk = _pick_tile(K, tk_cap, 128)
    out = pl.pallas_call(
        _linear_res_ln_kernel,
        out_shape=jax.ShapeDtypeStruct((Mp, N), jnp.bfloat16),
        grid_spec=pltpu.PrefetchScalarGridSpec(
            num_scalar_prefetch=0,
            grid=(Mp // tm, K // tk),
            in_specs=[
                pl.BlockSpec((tm, tk), lambda i, k: (i, k)),
                pl.BlockSpec((tk, N), lambda i, k: (k, 0)),
                pl.BlockSpec((1, N), lambda i, k: (0, 0)),
                pl.BlockSpec((tm, N), lambda i, k: (i, 0)),
                pl.BlockSpec((1, N), lambda i, k: (0, 0)),
                pl.BlockSpec((1, N), lambda i, k: (0, 0)),
            ],
            out_specs=pl.BlockSpec((tm, N), lambda i, k: (i, 0)),
            scratch_shapes=[pltpu.VMEM((tm, N), jnp.float32)],
        ),
        compiler_params=pltpu.CompilerParams(
            dimension_semantics=("parallel", "arbitrary"),
            vmem_limit_bytes=VMEM_LIMIT,
        ),
    )(xp, w, b.reshape(1, N), rp, gamma.reshape(1, N), beta.reshape(1, N))
    if Mp != M:
        out = out[:M]
    return out


# ----------------------------------------------------------------------------
# Embedding add + LayerNorm:  o = LN(word + (pos + tok)) * g + b
# word: (B, S, H), pos_tok: (S, H) — batch broadcast handled by the index_map.
# ----------------------------------------------------------------------------
def _emb_ln_kernel(x_ref, r_ref, g_ref, b_ref, o_ref):
    y = x_ref[0].astype(jnp.float32) + r_ref[...].astype(jnp.float32)
    mu = jnp.mean(y, axis=-1, keepdims=True)
    var = jnp.mean(jnp.square(y - mu), axis=-1, keepdims=True)
    o_ref[0] = (((y - mu) * jax.lax.rsqrt(var + LN_EPS)) * g_ref[...]
                + b_ref[...]).astype(o_ref.dtype)


def embed_add_layernorm(word, pos_tok, gamma, beta, *, ts_cap=512):
    B, S, H = word.shape
    ts = _pick_tile(S, ts_cap, 8)
    return pl.pallas_call(
        _emb_ln_kernel,
        out_shape=jax.ShapeDtypeStruct((B, S, H), jnp.bfloat16),
        grid=(B, S // ts),
        in_specs=[
            pl.BlockSpec((1, ts, H), lambda b, si: (b, si, 0)),
            pl.BlockSpec((ts, H), lambda b, si: (si, 0)),
            pl.BlockSpec((1, H), lambda b, si: (0, 0)),
            pl.BlockSpec((1, H), lambda b, si: (0, 0)),
        ],
        out_specs=pl.BlockSpec((1, ts, H), lambda b, si: (b, si, 0)),
        compiler_params=pltpu.CompilerParams(
            dimension_semantics=("parallel", "parallel"),
            vmem_limit_bytes=VMEM_LIMIT,
        ),
    )(word, pos_tok, gamma.reshape(1, H), beta.reshape(1, H))


# ----------------------------------------------------------------------------
# Multi-head attention straight from the fused (B, S, 3H) QKV tensor.
# Grid: (batch, query tiles).  All heads handled per block; output is written
# directly in (B, S, H) layout with a lane-dense (full-H) store.
# ----------------------------------------------------------------------------
def _attn_kernel(q_ref, k_ref, v_ref, m_ref, o_ref, *, scale, num_heads,
                 hidden, split_cols):
    q = q_ref[0]                          # (tq, H) or (tq, 3H) bf16
    k = k_ref[0]                          # (S,  H) or (S,  3H)
    v = v_ref[0]
    if not split_cols:                    # full-width fallback: slice columns
        q = q[:, :hidden]
        k = k[:, hidden:2 * hidden]
        v = v[:, 2 * hidden:3 * hidden]
    q = q * jnp.asarray(scale, q.dtype)   # fold 1/sqrt(hd) into Q (small mul)
    bias = m_ref[0]                       # (1, S) f32 additive mask bias

    hd = hidden // num_heads
    outs = []
    for h in range(num_heads):            # unrolled; one head's scores live at a time
        sl = slice(h * hd, (h + 1) * hd)
        s = jax.lax.dot_general(q[:, sl], k[:, sl], (((1,), (1,)), ((), ())),
                                preferred_element_type=jnp.float32)
        s = s + bias                      # (tq, S)
        m = jnp.max(s, axis=-1, keepdims=True)
        p = jnp.exp(s - m)
        p = p * pl.reciprocal(jnp.sum(p, axis=-1, keepdims=True), approx=True)
        outs.append(jnp.dot(p.astype(v.dtype), v[:, sl],
                            preferred_element_type=jnp.float32))
    o_ref[0] = jnp.concatenate(outs, axis=-1).astype(o_ref.dtype)


def mha_from_qkv(qkv, mask_bias, num_heads, *, tq_cap=256):
    """qkv: (B, S, 3H) bf16; mask_bias: (B, 1, S) f32 additive bias."""
    B, S, H3 = qkv.shape
    H = H3 // 3
    hd = H // num_heads
    scale = 1.0 / math.sqrt(hd)
    tq = _pick_tile(S, tq_cap, 8)

    split_cols = (H % 128 == 0)           # column blocks only when lane-aligned
    if split_cols:
        q_spec = pl.BlockSpec((1, tq, H), lambda b, qi: (b, qi, 0))
        k_spec = pl.BlockSpec((1, S, H), lambda b, qi: (b, 0, 1))
        v_spec = pl.BlockSpec((1, S, H), lambda b, qi: (b, 0, 2))
    else:
        q_spec = pl.BlockSpec((1, tq, H3), lambda b, qi: (b, qi, 0))
        k_spec = pl.BlockSpec((1, S, H3), lambda b, qi: (b, 0, 0))
        v_spec = pl.BlockSpec((1, S, H3), lambda b, qi: (b, 0, 0))

    return pl.pallas_call(
        functools.partial(_attn_kernel, scale=scale, num_heads=num_heads,
                          hidden=H, split_cols=split_cols),
        out_shape=jax.ShapeDtypeStruct((B, S, H), jnp.bfloat16),
        grid=(B, S // tq),
        in_specs=[q_spec, k_spec, v_spec,
                  pl.BlockSpec((1, 1, S), lambda b, qi: (b, 0, 0))],
        out_specs=pl.BlockSpec((1, tq, H), lambda b, qi: (b, qi, 0)),
        compiler_params=pltpu.CompilerParams(
            dimension_semantics=("parallel", "parallel"),
            vmem_limit_bytes=VMEM_LIMIT,
        ),
    )(qkv, qkv, qkv, mask_bias)


# ----------------------------------------------------------------------------
# Parameter init (deterministic, synthetic mini-BERT; matmul weights in bf16)
# ----------------------------------------------------------------------------
def init_params(key, vocab, max_pos, H, I, L, NH, num_classes):
    def nrm(k, shape, dtype=jnp.bfloat16):
        return (0.02 * jax.random.normal(k, shape)).astype(dtype)

    keys = jax.random.split(key, 6 + L)
    params = {
        "num_heads": NH,
        "word_emb": nrm(keys[0], (vocab, H)),
        "pos_emb": nrm(keys[1], (max_pos, H)),
        "tok_emb": nrm(keys[2], (2, H)),
        "emb_ln_g": jnp.ones((H,), jnp.float32),
        "emb_ln_b": jnp.zeros((H,), jnp.float32),
        # pooler (Linear(H, H) + tanh on CLS token)
        "wp": nrm(keys[3], (H, H)),
        "bp": jnp.zeros((H,), jnp.float32),
        # classifier head fc1: Linear(hidden_size, num_classes)
        "wc": nrm(keys[4], (H, num_classes)),
        "bc": jnp.zeros((num_classes,), jnp.float32),
        "layers": [],
    }
    for l in range(L):
        lk = jax.random.split(keys[6 + l], 6)
        wq, wk, wv = nrm(lk[0], (H, H)), nrm(lk[1], (H, H)), nrm(lk[2], (H, H))
        params["layers"].append({
            # fused QKV projection: one (H, 3H) matmul per layer
            "wqkv": jnp.concatenate([wq, wk, wv], axis=1),
            "bqkv": jnp.zeros((3 * H,), jnp.float32),
            "wo": nrm(lk[3], (H, H)), "bo": jnp.zeros((H,), jnp.float32),
            "ln1_g": jnp.ones((H,), jnp.float32),
            "ln1_b": jnp.zeros((H,), jnp.float32),
            "w1": nrm(lk[4], (H, I)), "b1": jnp.zeros((I,), jnp.float32),
            "w2": nrm(lk[5], (I, H)), "b2": jnp.zeros((H,), jnp.float32),
            "ln2_g": jnp.ones((H,), jnp.float32),
            "ln2_b": jnp.zeros((H,), jnp.float32),
        })
    return params


# ----------------------------------------------------------------------------
# Forward pass (= BERTClassifier.forward, eval mode)
# ----------------------------------------------------------------------------
def bert_classifier_forward(params, input_ids, attention_mask):
    B, S = input_ids.shape
    H = params["word_emb"].shape[1]
    NH = params["num_heads"]

    # --- embeddings (gathers are glue; add+LayerNorm runs in a Pallas kernel) ---
    word = params["word_emb"][input_ids]                          # (B, S, H) bf16
    pos_tok = params["pos_emb"][:S] + params["tok_emb"][0][None, :]  # (S, H), token_type_ids = 0
    h = embed_add_layernorm(word, pos_tok,
                            params["emb_ln_g"], params["emb_ln_b"])  # (B, S, H) bf16
    h = h.reshape(B * S, H)

    # additive attention-mask bias, HF BERT style: (1 - mask) * -10000, shape (B,1,S)
    mask_bias = ((1.0 - attention_mask.astype(jnp.float32)) * -10000.0)[:, None, :]

    # --- encoder layers ---
    for lyr in params["layers"]:
        qkv = linear(h, lyr["wqkv"], lyr["bqkv"]).reshape(B, S, 3 * H)   # fused QKV
        attn = mha_from_qkv(qkv, mask_bias, NH).reshape(B * S, H)
        # output projection + residual + LN fused into one kernel epilogue
        h = linear_residual_layernorm(attn, lyr["wo"], lyr["bo"], h,
                                      lyr["ln1_g"], lyr["ln1_b"])
        ff = linear(h, lyr["w1"], lyr["b1"], activation="gelu")
        # FFN down-projection + residual + LN fused as well
        h = linear_residual_layernorm(ff, lyr["w2"], lyr["b2"], h,
                                      lyr["ln2_g"], lyr["ln2_b"])

    # --- BERT pooler + classifier head: tiny matmuls (M=B), plain jnp is faster
    #     than a (1,1,1)-grid Pallas call here ---
    cls = h.reshape(B, S, H)[:, 0, :]                                   # (B, H) bf16
    pooled = jnp.tanh(jnp.dot(cls, params["wp"],
                              preferred_element_type=jnp.float32) + params["bp"])
    # --- dropout(p) is identity at inference (eval mode) ---
    logits = jnp.dot(pooled.astype(jnp.bfloat16), params["wc"],
                     preferred_element_type=jnp.float32) + params["bc"]
    return logits


# ----------------------------------------------------------------------------
if __name__ == "__main__":
    key = jax.random.PRNGKey(0)
    B, S = 2, 8           # batch, sequence length
    H, I = 32, 64         # hidden size, FFN intermediate size (mini-BERT)
    L, NH = 2, 4          # encoder layers, attention heads
    VOCAB, MAX_POS = 100, 16
    NUM_CLASSES = 3

    k_params, k_ids = jax.random.split(key)
    params = init_params(k_params, VOCAB, MAX_POS, H, I, L, NH, NUM_CLASSES)

    input_ids = jax.random.randint(k_ids, (B, S), 0, VOCAB, dtype=jnp.int32)
    attention_mask = jnp.array(
        [[1, 1, 1, 1, 1, 1, 1, 1],
         [1, 1, 1, 1, 1, 1, 0, 0]], dtype=jnp.float32)

    logits = bert_classifier_forward(params, input_ids, attention_mask)
    jax.block_until_ready(logits)
    assert logits.shape == (B, NUM_CLASSES)
    assert bool(jnp.all(jnp.isfinite(logits)))
    print("KERNEL_OK")
</pallas_src>

<mosaic_0001>
module attributes {stable_mosaic.version = 11 : i64} {
  func.func @_emb_ln_kernel(%arg0: i32, %arg1: i32, %arg2: memref<1x8x32xbf16, #tpu.memory_space<vmem>>, %arg3: memref<8x32xbf16, #tpu.memory_space<vmem>>, %arg4: memref<1x32xf32, #tpu.memory_space<vmem>>, %arg5: memref<1x32xf32, #tpu.memory_space<vmem>>, %arg6: memref<1x8x32xbf16, #tpu.memory_space<vmem>>) attributes {dimension_semantics = [#tpu.dimension_semantics<parallel>, #tpu.dimension_semantics<parallel>], iteration_bounds = array<i64: 2, 1>, scalar_prefetch = 0 : i64, scratch_operands = 0 : i64, tpu.core_type = #tpu.core_type<tc>, window_params = [{transform_indices = @transform_0, window_bounds = array<i64: 1, 8, 32>}, {transform_indices = @transform_1, window_bounds = array<i64: 8, 32>}, {pipeline_mode = #tpu.pipeline_mode<synchronous>, transform_indices = @transform_2, window_bounds = array<i64: 1, 32>}, {pipeline_mode = #tpu.pipeline_mode<synchronous>, transform_indices = @transform_3, window_bounds = array<i64: 1, 32>}, {transform_indices = @transform_4, window_bounds = array<i64: 1, 8, 32>}]} {
    %c0 = arith.constant 0 : index
    %c0_0 = arith.constant 0 : index
    %c0_1 = arith.constant 0 : index
    %0 = vector.load %arg2[%c0, %c0_0, %c0_1] : memref<1x8x32xbf16, #tpu.memory_space<vmem>>, vector<1x8x32xbf16>
    %1 = vector.shape_cast %0 : vector<1x8x32xbf16> to vector<8x32xbf16>
    %2 = arith.extf %1 : vector<8x32xbf16> to vector<8x32xf32>
    %c0_2 = arith.constant 0 : index
    %c0_3 = arith.constant 0 : index
    %3 = vector.load %arg3[%c0_2, %c0_3] : memref<8x32xbf16, #tpu.memory_space<vmem>>, vector<8x32xbf16>
    %4 = arith.extf %3 : vector<8x32xbf16> to vector<8x32xf32>
    %5 = arith.addf %2, %4 : vector<8x32xf32>
    %cst = arith.constant dense<0.000000e+00> : vector<8xf32>
    %6 = vector.multi_reduction <add>, %5, %cst [1] : vector<8x32xf32> to vector<8xf32>
    %7 = vector.shape_cast %6 : vector<8xf32> to vector<8x1xf32>
    %cst_4 = arith.constant 3.200000e+01 : f32
    %8 = vector.broadcast %cst_4 : f32 to vector<8x1xf32>
    %9 = arith.divf %7, %8 : vector<8x1xf32>
    %10 = vector.broadcast %9 : vector<8x1xf32> to vector<8x32xf32>
    %11 = arith.subf %5, %10 : vector<8x32xf32>
    %12 = arith.mulf %11, %11 : vector<8x32xf32>
    %cst_5 = arith.constant dense<0.000000e+00> : vector<8xf32>
    %13 = vector.multi_reduction <add>, %12, %cst_5 [1] : vector<8x32xf32> to vector<8xf32>
    %14 = vector.shape_cast %13 : vector<8xf32> to vector<8x1xf32>
    %cst_6 = arith.constant 3.200000e+01 : f32
    %15 = vector.broadcast %cst_6 : f32 to vector<8x1xf32>
    %16 = arith.divf %14, %15 : vector<8x1xf32>
    %17 = vector.broadcast %9 : vector<8x1xf32> to vector<8x32xf32>
    %18 = arith.subf %5, %17 : vector<8x32xf32>
    %cst_7 = arith.constant 9.99999996E-13 : f32
    %19 = vector.broadcast %cst_7 : f32 to vector<8x1xf32>
    %20 = arith.addf %16, %19 : vector<8x1xf32>
    %21 = math.rsqrt %20 : vector<8x1xf32>
    %22 = vector.broadcast %21 : vector<8x1xf32> to vector<8x32xf32>
    %23 = arith.mulf %18, %22 : vector<8x32xf32>
    %c0_8 = arith.constant 0 : index
    %c0_9 = arith.constant 0 : index
    %24 = vector.load %arg4[%c0_8, %c0_9] : memref<1x32xf32, #tpu.memory_space<vmem>>, vector<1x32xf32>
    %25 = vector.broadcast %24 : vector<1x32xf32> to vector<8x32xf32>
    %26 = arith.mulf %23, %25 : vector<8x32xf32>
    %c0_10 = arith.constant 0 : index
    %c0_11 = arith.constant 0 : index
    %27 = vector.load %arg5[%c0_10, %c0_11] : memref<1x32xf32, #tpu.memory_space<vmem>>, vector<1x32xf32>
    %28 = vector.broadcast %27 : vector<1x32xf32> to vector<8x32xf32>
    %29 = arith.addf %26, %28 : vector<8x32xf32>
    %30 = arith.truncf %29 : vector<8x32xf32> to vector<8x32xbf16>
    %c0_12 = arith.constant 0 : index
    %c0_13 = arith.constant 0 : index
    %c0_14 = arith.constant 0 : index
    %31 = vector.load %arg6[%c0_12, %c0_13, %c0_14] : memref<1x8x32xbf16, #tpu.memory_space<vmem>>, vector<1x8x32xbf16>
    %32 = vector.shape_cast %31 : vector<1x8x32xbf16> to vector<8x32xbf16>
    %33 = vector.shape_cast %30 : vector<8x32xbf16> to vector<1x8x32xbf16>
    tpu.vector_store %arg6[%c0_12, %c0_13, %c0_14], %33 {strides = array<i32>} : memref<1x8x32xbf16, #tpu.memory_space<vmem>>, vector<1x8x32xbf16>,
    return
  }
  func.func @transform_0(%arg0: i32, %arg1: i32) -> (i32, i32, i32) {
    %c0_i32 = arith.constant 0 : i32
    %c0_i32_0 = arith.constant 0 : i32
    return %arg0, %arg1, %c0_i32 : i32, i32, i32
  }
  func.func @transform_1(%arg0: i32, %arg1: i32) -> (i32, i32) {
    %c0_i32 = arith.constant 0 : i32
    %c0_i32_0 = arith.constant 0 : i32
    return %arg1, %c0_i32 : i32, i32
  }
  func.func @transform_2(%arg0: i32, %arg1: i32) -> (i32, i32) {
    %c0_i32 = arith.constant 0 : i32
    %c0_i32_0 = arith.constant 0 : i32
    %c0_i32_1 = arith.constant 0 : i32
    return %c0_i32, %c0_i32_0 : i32, i32
  }
  func.func @transform_3(%arg0: i32, %arg1: i32) -> (i32, i32) {
    %c0_i32 = arith.constant 0 : i32
    %c0_i32_0 = arith.constant 0 : i32
    %c0_i32_1 = arith.constant 0 : i32
    return %c0_i32, %c0_i32_0 : i32, i32
  }
  func.func @transform_4(%arg0: i32, %arg1: i32) -> (i32, i32, i32) {
    %c0_i32 = arith.constant 0 : i32
    %c0_i32_0 = arith.constant 0 : i32
    return %arg0, %arg1, %c0_i32 : i32, i32, i32
  }
}

</mosaic_0001>

<bundles_post_ra>
// kernel: tpu_custom_call.1
= control target key start
LH: loop header
LB: loop body
LE: loop exit
PB: predicated region body
PF: predicated region fallthrough
CT: control target
= control target key end

     0   :  { %9 = vsyncpa [#allocation3], 0  ;;  %s842_s0 = inlined_call_operand.hbm [shape: bf16[2,8,32], index: 0, kind: input, shape index: {}]   ;;  %s843_s1 = inlined_call_operand.hbm [shape: bf16[8,32], index: 1, kind: input, shape index: {}]   ;;  %s844_s2 = inlined_call_operand.vmem [shape: f32[1,32], index: 2, kind: input, shape index: {}]   ;;  %s845_s3 = inlined_call_operand.vmem [shape: f32[1,32], index: 3, kind: input, shape index: {}]   ;;  %s846_s4 = inlined_call_operand.hbm [shape: bf16[2,8,32], index: 4, kind: output, shape index: {}]  }
   0x1   :  { %11 = vsyncpa [#allocation3 + $0x1], 0 }
   0x2   :  { %12 = vsyncpa [#allocation6], 0 }
   0x3   :  { %13 = vsyncpa [#allocation4], 0 }
   0x4   :  { %15 = vsyncpa [#allocation4 + $0x1], 0  ;;  %s681_s15 = smov 0   ;;  %s683_s16 = smov 0  }
   0x5   :  { %s685_s17 = smov 0   ;;  %s687_s18 = smov 0  }
   0x6   :  { %s689_s19 = smov 0   ;;  %s691_s20 = smov 0  }
   0x7 LB: > { %s411_s21 = sadd.s32 4294967295, %s652_s20   ;;  %s412_s22 = sadd.s32 4294967294, %s652_s20   ;;  %s652_s20 = sphi %s691_s20, %s21_s20   ;;  %s648_s19 = sphi %s689_s19, %s858_s19   ;;  %s644_s18 = sphi %s687_s18, %s857_s18   ;;  %s640_s17 = sphi %s685_s17, %s856_s17   ;;  %s636_s16 = sphi %s683_s16, %s855_s16   ;;  %s632_s15 = sphi %s681_s15, %s854_s15  }
   0x8   : > { %p55_p0 = scmp.ne.s32.totalorder %s636_s16, %s632_s15  ;;  %p715_p1 = scmp.eq.s32.totalorder %s411_s21, 0 }
   0x9   : > { %p719_p2 = scmp.eq.s32.totalorder %s411_s21, 1  ;;  %p155_p3 = scmp.eq.s32.totalorder %s412_s22, 1 }
   0xa   : > { %p725_p4 = por %p715_p1, %p55_p0  ;;  %p413_p5 = scmp.ge.s32.totalorder %s652_s20, 1 }
   0xb   : > { %p730_p6 = por %p155_p3, %p55_p0  ;;  %p162_p7 = scmp.lt.s32.totalorder %s652_s20, 3 }
   0xc   : > { %s176_s29 = sshll.u32 %s843_s1, 4  ;;  %p415_p9 = scmp.ge.s32.totalorder %s652_s20, 2  ;;  %s177_s29 = int_to_ptr.hbm [resolvable:$true] %s176_s29 }
   0xd   : > { %p738_p8 = pnand %p413_p5, %p162_p7  ;;  %s654_s5 = smov [#allocation5]  }
   0xe   : > { %s178_s6 = sshll.u32 %s654_s5, 4  ;;  %s33_s7 = sadd.s32 1, %s648_s19  ;;  %s179_s6 = int_to_ptr.vmem [resolvable:$true] %s178_s6 }
   0xf   : > { %p434_p10 = pneg %p738_p8  ;;  %p35_p12 = scmp.ge.s32.totalorder %s33_s7, 2 }
  0x10   : > { %s42_s8 = sadd.s32 1, %s640_s17  ;;  %p49_p13 = scmp.ne.s32.totalorder %s640_s17, %s636_s16 }
  0x11   : > { %p435_p11 = pnand %p434_p10, %p715_p1  ;;  %p50_p0 = scmp.eq.s32.totalorder %s652_s20, 0 }
  0x12   : > { %s860_s7 = smov (%p35_p12, %s33_s7), 0  ;;  %p760_p5 = por %p719_p2, %p49_p13 }
  0x13   : > { %437 = dma.hbm_to_vmem [thread:$0]  (!%p435_p11), %s177_s29, 64, %s179_s6, [#allocation6]  }
  0x14   : > { %p754_p3 = por %p50_p0, %p49_p13  ;;  %s37_s11 = ssub.s32 %s648_s19, %s860_s7 }
  0x15   : > { %p447_p7 = scmp.lt.s32.totalorder %s652_s20, 2  ;;  %p40_p10 = scmp.eq.s32.totalorder %s37_s11, 0 }
  0x16   : > { %s195_s12 = sand.u32 1, %s640_s17   ;;  %s417_s21 = sshll.u32 %s648_s19, 2 }
  0x17   : > { %s416_s13 = sshll.u32 %s195_s12, 2  ;;  %s204_s28 = scalar_lea.hbm %s842_s0, %s417_s21 }
  0x18   : > { %s769_s14 = scalar_select %p40_p10, %s640_s17, %s42_s8  }
  0x19   : > { %s199_s29 = scalar_lea.vmem [#allocation2], %s416_s13  ;;  %s206_s24 = sshll.u32 %s204_s28, 4  ;;  %s207_s24 = int_to_ptr.hbm [resolvable:$true] %s206_s24 }
  0x1a   : > { %s208_s5 = sshll.u32 %s199_s29, 4  ;;  %p439_p2 = pnand %p447_p7, %p754_p3  ;;  %s209_s5 = int_to_ptr.vmem [resolvable:$true] %s208_s5 }
  0x1b   : > { %s196_s6 = scalar_lea.sflag [#allocation3], %s195_s12  ;;  %217 = sbr.rel (%p738_p8) target bundleno = 313 (0x139), region = 36 }
  0x1c   : > { %441 = dma.hbm_to_vmem [thread:$0]  (!%p439_p2), %s207_s24, 64, %s209_s5, %s196_s6  }
  0x1d   : > { %s780_s8 = sand.u32 (!%p738_p8), 1, %s636_s16  }
  0x1e   : > { %s419_s11 = sshll.u32 (!%p738_p8), %s780_s8, 2  ;;  %s220_s13 = scalar_lea.sflag (!%p738_p8), [#allocation3], %s780_s8 }
  0x1f   : > { %s223_s21 = scalar_lea.vmem (!%p738_p8), [#allocation2], %s419_s11 }
  0x20   : > { %619 = dma.done.wait (%p725_p4), %s220_s13, 64  }
  0x21   : > { %621 = vsyncadd (%p725_p4), %s220_s13, 4294967232 }
  0x22   : > { %623 = dma.done.wait (%p715_p1), [#allocation6], 64  }
  0x23   : > { %625 = vsyncadd (%p715_p1), [#allocation6], 4294967232  ;;  %v254_v0 = vld [vmem:[%s223_s21] sm:$0xf]  ;;  %v256_v1 = vld [vmem:[#allocation5] sm:$0xf] }
  0x24   : > { %v255_v2 = vunpack.c.l.bf16 %v254_v0  ;;  %v257_v3 = vunpack.c.l.bf16 %v256_v1  ;;  %vm259_vm0 = vcmask 261120   ;;  %v655_v6 = vmov 32.0   ;;  %s423_s23 = sshll.u32 %s644_s18, 2  ;;  %v500_v27 = vld [vmem:[%s844_s2] ss:$0 sm:$0xff]  ;;  %s253_s18 = scalar_lea.vmem [#allocation7], %s419_s11 }
  0x25   : > { %502 = vrcp.f32 %v655_v6  ;;  %v501_v29 = vld [vmem:[%s845_s3] ss:$0 sm:$0xff]  ;;  %s314_s28 = scalar_lea.hbm %s846_s4, %s423_s23  ;;  %s316_s29 = sshll.u32 %s253_s18, 4  ;;  %vm300_vm5 = vcmask 257024   ;;  %s317_s29 = int_to_ptr.vmem [resolvable:$true] %s316_s29 }
  0x26   : > { %v258_v4 = vadd.f32 %v257_v3, %v255_v2  ;;  %s318_s5 = sshll.u32 %s314_s28, 4  ;;  %s303_s24 = scalar_lea.sflag [#allocation4], %s780_s8  ;;  %s319_s5 = int_to_ptr.hbm [resolvable:$true] %s318_s5 }
  0x27   : > { %s580_s6 = sshra.s32 %s319_s5, 4  ;;  %s586_s11 = scalar_lea.hbm %s846_s4, 8  ;;  %s581_s6 = int_to_ptr.hbm [resolvable:$true] %s580_s6 }
  0x28   : > { %v260_v5 = vsel %vm259_vm0, %v258_v4, 0.0  ;;  %s582_s13 = scalar_lea.hbm %s581_s6, 4  ;;  %p587_p11 = scmp.lt.s32.totalorder %s581_s6, %s846_s4 }
  0x29   : > { %261 = vadd.xlane.f32.xlu0 %v260_v5  ;;  %p583_p1 = scmp.ne.s32.totalorder %s581_s6, %s582_s13  ;;  %p588_p12 = scmp.lt.s32.totalorder %s586_s11, %s582_s13 }
  0x2b   : > { %v503_v7 = vpop.eup %502  ;;  %p584_p4 = pnand %p583_p1, %p760_p5  ;;  %p589_p13 = por %p588_p12, %p587_p11 }
  0x2c   : > { %v264_v8 = vmul.f32 32.0, %v503_v7  ;;  %vm268_vm1 = vweird.f32 %v503_v7 }
  0x2d   : > { %p585_p8 = pneg %p584_p4 }
  0x2e   : > { %v265_v9 = vsub.f32 1.0, %v264_v8 }
  0x2f   : > { %p590_p0 = pnand %p589_p13, %p585_p8 }
  0x30   : > { %v266_v10 = vmul.f32 %v503_v7, %v265_v9 }
  0x32   : > { %v267_v11 = vadd.f32 %v503_v7, %v266_v10 }
  0x34   : > { %v269_v12 = vsel %vm268_vm1, %v503_v7, %v267_v11 }
  0x9c   : > { %v262_v13 = vpop.xlane.xlu0 %261 }
  0x9d   : > { %v270_v14 = vmul.f32 %v269_v12, %v262_v13 }
  0x9f   : > { %v271_v15 = vsub.f32 %v258_v4, %v270_v14 }
  0xa1   : > { %v272_v16 = vmul.f32 %v271_v15, %v271_v15 }
  0xa3   : > { %v273_v17 = vsel %vm259_vm0, %v272_v16, 0.0 }
  0xa4   : > { %274 = vadd.xlane.f32.xlu0 %v273_v17 }
 0x117   : > { %v275_v18 = vpop.xlane.xlu0 %274 }
 0x118   : > { %v276_v19 = vmul.f32 %v275_v18, %v269_v12 }
 0x11a   : > { %v277_v20 = vadd.f32 1e-12, %v276_v19 }
 0x11c   : > { %504 = vrsqrt.f32 %v277_v20  ;;  %vm284_vm3 = vweird.f32 %v277_v20 }
 0x122   : > { %v505_v21 = vpop.eup %504 }
 0x123   : > { %v279_v22 = vmul.f32 %v505_v21, %v277_v20  ;;  %vm285_vm2 = vweird.f32 %v505_v21 }
 0x124   : > { %vm286_vm4 = vmor %vm284_vm3, %vm285_vm2 }
 0x125   : > { %v280_v23 = vmul.f32 %v505_v21, %v279_v22 }
 0x127   : > { %v281_v24 = vmul.f32 0.5, %v280_v23 }
 0x129   : > { %v282_v25 = vsub.f32 1.5, %v281_v24 }
 0x12b   : > { %v283_v26 = vmul.f32 %v505_v21, %v282_v25 }
 0x12d   : > { %v287_v28 = vsel %vm286_vm4, %v505_v21, %v283_v26 }
 0x12e   : > { %v288_v30 = vmul.f32 %v287_v28, %v271_v15 }
 0x130   : > { %v293_v31 = vmul.f32 %v500_v27, %v288_v30 }
 0x132   : > { %v298_v32 = vadd.f32 %v501_v29, %v293_v31 }
 0x134   : > { %v299_v33 = vpack.c.bf16 %v298_v32, %v298_v32 }
 0x136   : > { %301 = vst.msk [vmem:[%s253_s18] sm:$0xf] %vm300_vm5, %v299_v33 }
 0x137   : > { %593 = shalt.err (!%p590_p0)
}
 0x138   : > { %432 = dma.vmem_to_hbm [thread:$0]  (%p760_p5), %s317_s29, 64, %s319_s5, %s303_s24  }
 0x139 PF: > { %s330_s8 = sand.u32 1, %s632_s15   ;;  %p443_p3 = pnand %p415_p9, %p730_p6 }
 0x13a   : > { %s331_s9 = scalar_lea.sflag [#allocation4], %s330_s8 }
 0x13b   : > { %p444_p7 = pneg %p443_p3 }
 0x13d   : > { %627 = dma.done.wait (%p444_p7), %s331_s9, 64  }
 0x13e   : > { %629 = vsyncadd (%p444_p7), %s331_s9, 4294967232  ;;  %s21_s20 = sadd.s32 1, %s652_s20   ;;  %s854_s15 = smov %s636_s16 }
 0x13f   : > { %p18_p10 = scmp.ge.s32.totalorder %s21_s20, 4   ;;  %s855_s16 = smov %s640_s17 }
 0x140   : > { %s856_s17 = smov %s769_s14  ;;  %s857_s18 = smov %s648_s19 }
 0x141   : > { %s858_s19 = smov %s860_s7  ;;  %20 = sbr.rel (!%p18_p10) target bundleno = 7 (0x7), region = 86 }
 0x146   :  { %337 = vsyncpa [#allocation3], 1 }
 0x147   :  { %339 = vsyncpa [#allocation3 + $0x1], 1 }
 0x148   :  { %340 = vsyncpa [#allocation6], 1 }
 0x149   :  { %341 = vsyncpa [#allocation4], 1 }
 0x14a   :  { %343 = vsyncpa [#allocation4 + $0x1], 1 }

</bundles_post_ra>
